<compile_context>
chip_gen: v5e
topology: v5e:2x2
jax: 0.10.0
libtpu: 0.0.40
codegen_flags: <defaults>
</compile_context>

<pallas_src>
import jax
import jax.numpy as jnp
from jax.experimental import pallas as pl
from jax.experimental.pallas import tpu as pltpu


def _round_up(x, m):
    return ((x + m - 1) // m) * m


def _bias_add_kernel(b_ref, x_ref, o_ref):
    # b_ref: (block_rows, 1) per-row bias tile -> broadcasts along the lane axis.
    # x_ref / o_ref: (block_rows, block_lanes) activation tiles.
    o_ref[...] = x_ref[...] + b_ref[...]


def learnable_bias_forward(x, bias, *, target_block_bytes=2 * 1024 * 1024,
                           max_block_lanes=8192):
    """x: (N, C, H, W); bias: (1, C, 1, 1). Returns x + bias broadcast, same shape/dtype."""
    N, C, H, W = x.shape
    assert bias.shape == (1, C, 1, 1)

    HW = H * W
    rows = N * C
    itemsize = jnp.dtype(x.dtype).itemsize
    sublane = {4: 8, 2: 16, 1: 32}.get(itemsize, 8)   # vreg sublane packing per dtype

    # Lane-dense 2D slab: (N*C, H*W), H*W on the lane (fast) axis. reshape of a
    # contiguous array is free; no extra HBM round trip.
    x2d = x.reshape(rows, HW)

    # Lane block: multiple of 128 (capped). If H*W is not a multiple of 128 the
    # tail block is masked by Pallas; padding in the wrapper would cost a full
    # extra HBM round trip, so we don't.
    block_lanes = min(_round_up(HW, 128), max_block_lanes)
    num_lane_blocks = pl.cdiv(HW, block_lanes)

    # Row block: sized so each x tile is ~target_block_bytes (HBM-bound op; large
    # tiles amortize per-grid-step overhead), rounded to the dtype's sublane pack
    # so loads/stores are unmasked full-vreg ops.
    rows_target = max(1, target_block_bytes // (block_lanes * itemsize))
    block_rows = _round_up(min(rows, rows_target), sublane)
    num_row_blocks = pl.cdiv(rows, block_rows)

    # Bias: one scalar per (n, c) row. The broadcast writes only N*C elements to
    # HBM once; each grid step then DMAs a tiny contiguous (block_rows, 1) tile.
    b_col = jnp.broadcast_to(bias.reshape(1, C), (N, C)).reshape(rows, 1).astype(x.dtype)

    grid = (num_row_blocks, num_lane_blocks)

    # VMEM budget: double-buffered x + out tiles, plus the small double-buffered
    # bias tile ((block_rows, 1) pads to 128 lanes in VMEM), plus slack. Capped
    # well under v7x's 64 MiB physical VMEM.
    block_bytes = block_rows * block_lanes * itemsize
    bias_block_bytes = block_rows * 128 * 4
    vmem_limit = min(max(4 * block_bytes + 2 * bias_block_bytes + (4 << 20), 16 << 20),
                     48 << 20)

    out2d = pl.pallas_call(
        _bias_add_kernel,
        out_shape=jax.ShapeDtypeStruct((rows, HW), x.dtype),
        grid_spec=pltpu.PrefetchScalarGridSpec(
            num_scalar_prefetch=0,
            grid=grid,
            in_specs=[
                pl.BlockSpec((block_rows, 1), lambda i, j: (i, 0)),
                pl.BlockSpec((block_rows, block_lanes), lambda i, j: (i, j)),
            ],
            out_specs=pl.BlockSpec((block_rows, block_lanes), lambda i, j: (i, j)),
        ),
        compiler_params=pltpu.CompilerParams(
            dimension_semantics=("parallel", "parallel"),
            vmem_limit_bytes=vmem_limit,
        ),
    )(b_col, x2d)

    return out2d.reshape(N, C, H, W)


if __name__ == "__main__":
    key = jax.random.PRNGKey(0)
    kx, kb, kx2, kb2 = jax.random.split(key, 4)

    # Primary test (lane-aligned H*W = 256).
    N, C, H, W = 2, 4, 16, 16
    x = jax.random.normal(kx, (N, C, H, W), dtype=jnp.float32)
    # Parameter shape from LearnableBias.__init__: (1, out_chn, 1, 1). The module
    # initializes it to zeros; use a non-zero init so the kernel does real work.
    bias = 0.1 * jax.random.normal(kb, (1, C, 1, 1), dtype=jnp.float32)

    out = learnable_bias_forward(x, bias)
    out = jax.block_until_ready(out)
    ref = x + jnp.broadcast_to(bias, x.shape)
    assert out.shape == x.shape and out.dtype == x.dtype
    assert jnp.allclose(out, ref, atol=1e-6, rtol=1e-6)

    # Secondary test: non-multiple-of-128 spatial (14x14) and N*C not a multiple
    # of 8 -> exercises the masked-tail row and lane paths.
    N2, C2, H2, W2 = 2, 3, 14, 14
    x2 = jax.random.normal(kx2, (N2, C2, H2, W2), dtype=jnp.float32)
    bias2 = 0.1 * jax.random.normal(kb2, (1, C2, 1, 1), dtype=jnp.float32)

    out2 = learnable_bias_forward(x2, bias2)
    out2 = jax.block_until_ready(out2)
    ref2 = x2 + jnp.broadcast_to(bias2, x2.shape)
    assert out2.shape == x2.shape and out2.dtype == x2.dtype
    assert jnp.allclose(out2, ref2, atol=1e-6, rtol=1e-6)

    print("KERNEL_OK")
</pallas_src>

<mosaic_0001>
module attributes {stable_mosaic.version = 11 : i64} {
  func.func @_bias_add_kernel(%arg0: i32, %arg1: i32, %arg2: memref<8x1xf32, #tpu.memory_space<vmem>>, %arg3: memref<8x256xf32, #tpu.memory_space<vmem>>, %arg4: memref<8x256xf32, #tpu.memory_space<vmem>>) attributes {dimension_semantics = [#tpu.dimension_semantics<parallel>, #tpu.dimension_semantics<parallel>], iteration_bounds = array<i64: 1, 1>, scalar_prefetch = 0 : i64, scratch_operands = 0 : i64, tpu.core_type = #tpu.core_type<tc>, window_params = [{transform_indices = @transform_0, window_bounds = array<i64: 8, 1>}, {transform_indices = @transform_1, window_bounds = array<i64: 8, 256>}, {transform_indices = @transform_2, window_bounds = array<i64: 8, 256>}]} {
    %c0 = arith.constant 0 : index
    %c0_0 = arith.constant 0 : index
    %0 = vector.load %arg3[%c0, %c0_0] : memref<8x256xf32, #tpu.memory_space<vmem>>, vector<8x256xf32>
    %c0_1 = arith.constant 0 : index
    %c0_2 = arith.constant 0 : index
    %1 = vector.load %arg2[%c0_1, %c0_2] : memref<8x1xf32, #tpu.memory_space<vmem>>, vector<8x1xf32>
    %2 = vector.broadcast %1 : vector<8x1xf32> to vector<8x256xf32>
    %3 = arith.addf %0, %2 : vector<8x256xf32>
    %c0_3 = arith.constant 0 : index
    %c0_4 = arith.constant 0 : index
    %4 = vector.load %arg4[%c0_3, %c0_4] : memref<8x256xf32, #tpu.memory_space<vmem>>, vector<8x256xf32>
    tpu.vector_store %arg4[%c0_3, %c0_4], %3 {strides = array<i32>} : memref<8x256xf32, #tpu.memory_space<vmem>>, vector<8x256xf32>,
    return
  }
  func.func @transform_0(%arg0: i32, %arg1: i32) -> (i32, i32) {
    %c0_i32 = arith.constant 0 : i32
    %c0_i32_0 = arith.constant 0 : i32
    return %arg0, %c0_i32 : i32, i32
  }
  func.func @transform_1(%arg0: i32, %arg1: i32) -> (i32, i32) {
    %c0_i32 = arith.constant 0 : i32
    return %arg0, %arg1 : i32, i32
  }
  func.func @transform_2(%arg0: i32, %arg1: i32) -> (i32, i32) {
    %c0_i32 = arith.constant 0 : i32
    return %arg0, %arg1 : i32, i32
  }
}

</mosaic_0001>

<bundles_post_ra>
// kernel: tpu_custom_call.1
= control target key start
LH: loop header
LB: loop body
LE: loop exit
PB: predicated region body
PF: predicated region fallthrough
CT: control target
= control target key end

     0   :  { %7 = vsyncpa [#allocation3], 0  ;;  %s138_s0 = inlined_call_operand.vmem [shape: f32[8,1], index: 0, kind: input, shape index: {}]   ;;  %s139_s1 = inlined_call_operand.hbm [shape: f32[8,256], index: 1, kind: input, shape index: {}]   ;;  %s140_s2 = inlined_call_operand.hbm [shape: f32[8,256], index: 2, kind: output, shape index: {}]  }
   0x1   :  { %8 = vsyncpa [#allocation4], 0  ;;  %s16_s11 = sshll.u32 %s139_s1, 4  ;;  %s111_s12 = smov [#allocation2]   ;;  %s17_s11 = int_to_ptr.hbm [resolvable:$true] %s16_s11 }
   0x2   :  { %s18_s13 = sshll.u32 %s111_s12, 4  ;;  %s19_s13 = int_to_ptr.vmem [resolvable:$true] %s18_s13 }
   0x3   :  { %21 = dma.hbm_to_vmem [thread:$0]  %s17_s11, 256, %s19_s13, [#allocation3]  }
   0x4   :  { %107 = dma.done.wait [#allocation3], 256  }
   0x5   :  { %108 = vsyncadd [#allocation3], 4294967040  ;;  %v112_v0 = vmov 0   ;;  %v28_v1 = vld [vmem:[%s138_s0] sm:$0xff]  ;;  %v27_v3 = vld [vmem:[#allocation2 + $0x8] sm:$0xff]  ;;  %s113_s16 = smov [#allocation5]  }
   0x6   :  { %58 = vset.pattern.permute.xlu0 %v112_v0  ;;  %v26_v2 = vld [vmem:[#allocation2] sm:$0xff]  ;;  %s43_s17 = sshll.u32 %s113_s16, 4  ;;  %s45_s19 = sshll.u32 %s140_s2, 4  ;;  %s44_s17 = int_to_ptr.vmem [resolvable:$true] %s43_s17  ;;  %s46_s19 = int_to_ptr.hbm [resolvable:$true] %s45_s19 }
   0x7   :  { %31 = vperm.xlu0 %58, %v28_v1  }
  0x79   :  { %v32_v4 = vpop.permute.xlu0 %31 }
  0x7a   :  { %v34_v5 = vadd.f32 %v32_v4, %v26_v2  ;;  %v35_v6 = vadd.f32 %v32_v4, %v27_v3 }
  0x7c   :  { %36 = vst [vmem:[#allocation5] sm:$0xff] %v34_v5 }
  0x7d   :  { %37 = vst [vmem:[#allocation5 + $0x8] sm:$0xff] %v35_v6 }
  0x7e   :  { %48 = dma.vmem_to_hbm [thread:$0]  %s44_s17, 256, %s46_s19, [#allocation4]  }
  0x7f   :  { %109 = dma.done.wait [#allocation4], 256  }
  0x80   :  { %110 = vsyncadd [#allocation4], 4294967040 }
  0x81   :  { %53 = vsyncpa [#allocation3], 1 }
  0x82   :  { %54 = vsyncpa [#allocation4], 1 }

</bundles_post_ra>
